<compile_context>
chip_gen: v6e
topology: v6e:2x2x1
jax: 0.10.0
libtpu: 0.0.40
codegen_flags: <defaults>
</compile_context>

<pallas_src>
import jax
import jax.numpy as jnp
from jax.experimental import pallas as pl
from jax.experimental.pallas import tpu as pltpu


# ----------------------------------------------------------------------------
# Kernel: one (TM, TN) tile of x times the matching (1, TN) slice of gamma.
# gamma is kept in f32; the product is cast to the output dtype.
# ----------------------------------------------------------------------------
def _layer_scale_kernel(x_ref, g_ref, o_ref):
    o_ref[...] = (x_ref[...].astype(jnp.float32) * g_ref[...]).astype(o_ref.dtype)


# ----------------------------------------------------------------------------
# Wrapper
# ----------------------------------------------------------------------------
def layer_scale(x, gamma, *, inplace=False, block_rows=1024):
    """Pallas TPU implementation of LayerScale: x * gamma (gamma over last dim).

    x:       (..., dim) array, any floating dtype.
    gamma:   (dim,) parameter (kept in f32 inside the kernel).
    inplace: emulate PyTorch inplace=True via input_output_aliases (the input
             slab buffer is donated to the output).
    """
    orig_shape = x.shape
    dim = orig_shape[-1]
    assert gamma.shape == (dim,), f"gamma shape {gamma.shape} != ({dim},)"

    # Flatten leading dims into a single row axis -> (M, dim) slab.
    m = 1
    for s in orig_shape[:-1]:
        m *= s
    x2 = x.reshape(m, dim)
    g1 = gamma.astype(jnp.float32)

    # --- Small-dim lane folding: make the last dim lane-dense (=128) --------
    fold, pad_rows = 1, 0
    if dim < 128 and (128 % dim == 0):
        fold = 128 // dim
        pad_rows = (-m) % fold
        if pad_rows:
            x2 = jnp.pad(x2, ((0, pad_rows), (0, 0)))
        x2 = x2.reshape((m + pad_rows) // fold, fold * dim)
        g1 = jnp.tile(g1, fold)

    mk, dk = x2.shape
    g2 = g1.reshape(1, dk)

    # --- Tile selection ------------------------------------------------------
    itemsize = jnp.dtype(x.dtype).itemsize
    tile_budget = 16 * 1024 * 1024  # bytes for 2x(x tile) + 2x(out tile)

    # Lane tile: prefer full width (contiguous DMA, gamma resident).  Only
    # lane-split for dims so large that even an 8-row full-width tile would
    # not fit the budget; the split tile is a 128-multiple, and pl.cdiv plus
    # Pallas padding handle a partial last lane tile for any dim.
    max_full_dim = tile_budget // (4 * 8 * itemsize)
    tn = dk if dk <= max_full_dim else 4096

    # Row tile: as many rows as the budget allows, capped at block_rows.
    max_tm = tile_budget // (4 * tn * itemsize)
    tm = min(block_rows, max_tm)
    tm = max(8, (tm // 8) * 8)
    if tm >= mk:
        tm = mk  # full extent (exempt from the sublane-multiple rule)

    # Keep at least two grid steps for megacore sharding on mid-size slabs.
    if pl.cdiv(mk, tm) * pl.cdiv(dk, tn) == 1 and mk >= 512:
        tm = max(8, ((mk // 2) // 8) * 8)

    grid = (pl.cdiv(mk, tm), pl.cdiv(dk, tn))

    out2 = pl.pallas_call(
        _layer_scale_kernel,
        out_shape=jax.ShapeDtypeStruct((mk, dk), x.dtype),
        grid=grid,
        in_specs=[
            pl.BlockSpec((tm, tn), lambda i, j: (i, j)),   # x tile
            pl.BlockSpec((1, tn), lambda i, j: (0, j)),    # gamma slice (resident when tn == dk)
        ],
        out_specs=pl.BlockSpec((tm, tn), lambda i, j: (i, j)),
        input_output_aliases={0: 0} if inplace else {},
        compiler_params=pltpu.CompilerParams(
            dimension_semantics=("parallel", "parallel"),  # megacore-shardable on v7x
            vmem_limit_bytes=32 * 1024 * 1024,             # safe on v5e/v6e/v7x
        ),
    )(x2, g2)

    # --- Undo folding / padding ----------------------------------------------
    if fold > 1:
        out2 = out2.reshape(mk * fold, dim)
        if pad_rows:
            out2 = out2[:m]
    return out2.reshape(orig_shape)


# ----------------------------------------------------------------------------
if __name__ == "__main__":
    key = jax.random.PRNGKey(0)
    k1, k2, k3, k4 = jax.random.split(key, 4)
    init_values = 1e-5  # PyTorch LayerScale default

    def ref_fn(x, g):
        return (x.astype(jnp.float32) * g.astype(jnp.float32)).astype(x.dtype)

    # Case 1: small dim (<128) -> lane-folding path (folded lane width = 128).
    x1 = jax.random.normal(k1, (2, 8, 32), jnp.float32)
    g1 = init_values * jnp.ones((32,), jnp.float32)
    o1 = layer_scale(x1, g1)
    jax.block_until_ready(o1)
    assert o1.shape == x1.shape
    assert jnp.allclose(o1, ref_fn(x1, g1), atol=1e-6, rtol=1e-6)

    # Case 2: lane-dense dim with real row tiling (grid rows > 1, tn = dim).
    x2 = jax.random.normal(k2, (4, 512, 256), jnp.float32)
    g2 = init_values * jnp.ones((256,), jnp.float32)
    o2 = layer_scale(x2, g2)
    jax.block_until_ready(o2)
    assert o2.shape == x2.shape
    assert jnp.allclose(o2, ref_fn(x2, g2), atol=1e-6, rtol=1e-6)

    # Case 3: bf16 activations; gamma kept in f32 inside the kernel.
    x3 = jax.random.normal(k3, (2, 16, 128), jnp.bfloat16)
    g3 = init_values * jnp.ones((128,), jnp.float32)
    o3 = layer_scale(x3, g3)
    jax.block_until_ready(o3)
    assert o3.dtype == jnp.bfloat16
    assert jnp.allclose(o3.astype(jnp.float32), ref_fn(x3, g3).astype(jnp.float32),
                        atol=1e-7, rtol=2e-2)

    # Case 4: inplace variant (input_output_aliases -> PyTorch x.mul_ semantics).
    x4 = jax.random.normal(k4, (2, 8, 128), jnp.float32)
    g4 = init_values * jnp.ones((128,), jnp.float32)
    ref4 = ref_fn(x4, g4)
    o4 = layer_scale(x4, g4, inplace=True)
    jax.block_until_ready(o4)
    assert jnp.allclose(o4, ref4, atol=1e-6, rtol=1e-6)

    print("KERNEL_OK")
</pallas_src>

<mosaic_0001>
module attributes {stable_mosaic.version = 11 : i64} {
  func.func @_layer_scale_kernel(%arg0: i32, %arg1: i32, %arg2: memref<4x128xf32, #tpu.memory_space<vmem>>, %arg3: memref<1x128xf32, #tpu.memory_space<vmem>>, %arg4: memref<4x128xf32, #tpu.memory_space<vmem>>) attributes {dimension_semantics = [#tpu.dimension_semantics<parallel>, #tpu.dimension_semantics<parallel>], iteration_bounds = array<i64: 1, 1>, scalar_prefetch = 0 : i64, scratch_operands = 0 : i64, tpu.core_type = #tpu.core_type<tc>, window_params = [{transform_indices = @transform_0, window_bounds = array<i64: 4, 128>}, {transform_indices = @transform_1, window_bounds = array<i64: 1, 128>}, {transform_indices = @transform_2, window_bounds = array<i64: 4, 128>}]} {
    %c0 = arith.constant 0 : index
    %c0_0 = arith.constant 0 : index
    %0 = vector.load %arg2[%c0, %c0_0] : memref<4x128xf32, #tpu.memory_space<vmem>>, vector<4x128xf32>
    %c0_1 = arith.constant 0 : index
    %c0_2 = arith.constant 0 : index
    %1 = vector.load %arg3[%c0_1, %c0_2] : memref<1x128xf32, #tpu.memory_space<vmem>>, vector<1x128xf32>
    %2 = vector.broadcast %1 : vector<1x128xf32> to vector<4x128xf32>
    %3 = arith.mulf %0, %2 : vector<4x128xf32>
    %c0_3 = arith.constant 0 : index
    %c0_4 = arith.constant 0 : index
    %4 = vector.load %arg4[%c0_3, %c0_4] : memref<4x128xf32, #tpu.memory_space<vmem>>, vector<4x128xf32>
    tpu.vector_store %arg4[%c0_3, %c0_4], %3 {strides = array<i32>} : memref<4x128xf32, #tpu.memory_space<vmem>>, vector<4x128xf32>,
    return
  }
  func.func @transform_0(%arg0: i32, %arg1: i32) -> (i32, i32) {
    %c0_i32 = arith.constant 0 : i32
    return %arg0, %arg1 : i32, i32
  }
  func.func @transform_1(%arg0: i32, %arg1: i32) -> (i32, i32) {
    %c0_i32 = arith.constant 0 : i32
    %c0_i32_0 = arith.constant 0 : i32
    return %c0_i32, %arg1 : i32, i32
  }
  func.func @transform_2(%arg0: i32, %arg1: i32) -> (i32, i32) {
    %c0_i32 = arith.constant 0 : i32
    return %arg0, %arg1 : i32, i32
  }
}

</mosaic_0001>

<bundles_post_ra>
// kernel: tpu_custom_call.1
= control target key start
LH: loop header
LB: loop body
LE: loop exit
PB: predicated region body
PF: predicated region fallthrough
CT: control target
= control target key end

     0   :  { %7 = vsyncpa [#allocation3], 0  ;;  %s122_s0 = inlined_call_operand.hbm [shape: f32[4,128], index: 0, kind: input, shape index: {}]   ;;  %s123_s1 = inlined_call_operand.vmem [shape: f32[1,128], index: 1, kind: input, shape index: {}]   ;;  %s124_s2 = inlined_call_operand.hbm [shape: f32[4,128], index: 2, kind: output, shape index: {}]  }
   0x1   :  { %8 = vsyncpa [#allocation4], 0  ;;  %s96_s9 = smov [#allocation2]  }
   0x2   :  { %s15_s10 = sshll.u32 %s96_s9, 4  ;;  %s16_s10 = int_to_ptr.vmem [resolvable:$true] %s15_s10 }
   0x3   :  { %s60_s11 = scalar_lea.vmem %s16_s10, 64  ;;  %p65_p1 = scmp.lt.s32.totalorder %s16_s10, %s16_s10 }
   0x4   :  { %p61_p0 = scmp.ne.s32.totalorder %s16_s10, %s60_s11  ;;  %p66_p2 = scmp.lt.s32.totalorder %s60_s11, %s60_s11 }
   0x6   :  { %p67_p3 = por %p66_p2, %p65_p1 }
   0x8   :  { %p68_p4 = pnand %p67_p3, %p61_p0 }
   0xa   :  { %71 = shalt.err (!%p68_p4)
}
   0xb   :  { %18 = dma.hbm_to_vmem [thread:$0]  %s122_s0, 64, %s16_s10, [#allocation3]  }
   0xc   :  { %92 = dma.done.wait [#allocation3], 64  }
   0xd   :  { %93 = vsyncadd [#allocation3], 4294967232  ;;  %s97_s14 = smov [#allocation5]   ;;  %v24_v0 = vld [vmem:[#allocation2] sm:$0xf] }
   0xe   :  { %s40_s15 = sshll.u32 %s97_s14, 4  ;;  %v49_v1 = vld [vmem:[%s123_s1] ss:$0 sm:$0xff]  ;;  %s41_s15 = int_to_ptr.vmem [resolvable:$true] %s40_s15 }
   0xf   :  { %v32_v2 = vmul.f32 %v49_v1, %v24_v0  ;;  %s72_s18 = scalar_lea.vmem %s41_s15, 64  ;;  %p77_p6 = scmp.lt.s32.totalorder %s41_s15, %s41_s15 }
  0x10   :  { %p73_p5 = scmp.ne.s32.totalorder %s41_s15, %s72_s18  ;;  %p78_p7 = scmp.lt.s32.totalorder %s72_s18, %s72_s18 }
  0x11   :  { %33 = vst [vmem:[#allocation5] sm:$0xf] %v32_v2 }
  0x12   :  { %p79_p8 = por %p78_p7, %p77_p6 }
  0x14   :  { %p80_p9 = pnand %p79_p8, %p73_p5 }
  0x16   :  { %83 = shalt.err (!%p80_p9)
}
  0x17   :  { %43 = dma.vmem_to_hbm [thread:$0]  %s41_s15, 64, %s124_s2, [#allocation4]  }
  0x18   :  { %94 = dma.done.wait [#allocation4], 64  }
  0x19   :  { %95 = vsyncadd [#allocation4], 4294967232 }
  0x1a   :  { %47 = vsyncpa [#allocation3], 1 }
  0x1b   :  { %48 = vsyncpa [#allocation4], 1 }

</bundles_post_ra>
